<compile_context>
chip_gen: v7x
topology: tpu7x:2x2x1
jax: 0.10.0
libtpu: 0.0.40
codegen_flags: <defaults>
</compile_context>

<pallas_src>
import jax
import jax.numpy as jnp
from jax.experimental import pallas as pl
from jax.experimental.pallas import tpu as pltpu


def _mlp5_kernel(x_ref, w1_ref, b1_ref, w2_ref, b2_ref, out_ref):
    # x_ref: (TM, F)  w1: (F, 512)  b1: (1, 512)  w2: (512, 7)  b2: (1, 7)
    x = x_ref[...]

    # Hidden layer: relu(x @ W1 + b1)
    h = jnp.dot(x, w1_ref[...], preferred_element_type=jnp.float32) + b1_ref[...]
    h = jnp.maximum(h, 0.0)

    # Fused output projection: columns 0..2 = trans, 3..6 = quat (+[1,0,0,0] baked in b2)
    y = jnp.dot(h, w2_ref[...], preferred_element_type=jnp.float32) + b2_ref[...]

    col = jax.lax.broadcasted_iota(jnp.int32, y.shape, 1)
    is_trans = col < 3

    # Quaternion normalization over columns 3..6 only.
    quat = jnp.where(is_trans, 0.0, y)
    qss = jnp.sum(quat * quat, axis=-1, keepdims=True)
    inv = 1.0 / jnp.sqrt(1e-12 + qss)

    out = jnp.where(is_trans, jnp.tanh(y), y * inv)
    out_ref[...] = out.astype(out_ref.dtype)


def _round_up(x, m):
    return ((x + m - 1) // m) * m


def mlp5_forward(feat, w_mlp, b_mlp, w_trans, b_trans, w_quat, b_quat, *, block_m=256):
    """MLP5 forward.  feat: (..., F).  Returns (..., 7)."""
    *lead, F = feat.shape
    M = 1
    for d in lead:
        M *= d
    H = w_mlp.shape[0]  # 512

    x2d = feat.reshape(M, F)

    # Row tile: biggest of block_m that still respects the sublane-8 rule.
    tm = min(block_m, _round_up(M, 8))
    m_pad = _round_up(M, tm)
    if m_pad != M:
        x2d = jnp.pad(x2d, ((0, m_pad - M), (0, 0)))

    # Pre-transposed, fused weights / biases (done once, outside the kernel).
    w1 = jnp.transpose(w_mlp)                                                 # (F, 512)
    b1 = b_mlp.reshape(1, H)
    w2 = jnp.concatenate([jnp.transpose(w_trans), jnp.transpose(w_quat)], 1)  # (512, 7)
    quat_init = jnp.array([1.0, 0.0, 0.0, 0.0], dtype=feat.dtype)
    b2 = jnp.concatenate([b_trans, b_quat + quat_init]).reshape(1, 7)

    grid = (m_pad // tm,)

    out2d = pl.pallas_call(
        _mlp5_kernel,
        out_shape=jax.ShapeDtypeStruct((m_pad, 7), feat.dtype),
        grid_spec=pltpu.PrefetchScalarGridSpec(
            num_scalar_prefetch=0,
            grid=grid,
            in_specs=[
                pl.BlockSpec((tm, F), lambda i: (i, 0)),   # activation tile (streams)
                pl.BlockSpec((F, H), lambda i: (0, 0)),    # W1 resident
                pl.BlockSpec((1, H), lambda i: (0, 0)),    # b1 resident
                pl.BlockSpec((H, 7), lambda i: (0, 0)),    # fused W2 resident
                pl.BlockSpec((1, 7), lambda i: (0, 0)),    # fused b2 resident
            ],
            out_specs=pl.BlockSpec((tm, 7), lambda i: (i, 0)),
        ),
        compiler_params=pltpu.CompilerParams(
            dimension_semantics=("parallel",)),
    )(x2d, w1, b1, w2, b2)

    return out2d[:M].reshape(*lead, 7)


def _mlp5_reference(feat, w_mlp, b_mlp, w_trans, b_trans, w_quat, b_quat):
    """Pure-JAX reference matching the PyTorch MLP5 forward."""
    h = jax.nn.relu(feat @ w_mlp.T + b_mlp)
    trans = jnp.tanh(h @ w_trans.T + b_trans)
    quat = h @ w_quat.T + b_quat + jnp.array([1.0, 0.0, 0.0, 0.0], feat.dtype)
    quat = quat / jnp.sqrt(1e-12 + jnp.sum(quat * quat, axis=-1, keepdims=True))
    return jnp.concatenate([trans, quat], axis=-1)


if __name__ == "__main__":
    # Small shapes consistent with the module's forward (B x P x F -> B x P x 7).
    B, P, feat_len = 2, 16, 32
    H = 512  # fixed by the module (nn.Linear(feat_len, 512))

    key = jax.random.PRNGKey(0)
    k_x, k_w1, k_b1, k_wt, k_bt, k_wq = jax.random.split(key, 6)

    # PyTorch-style uniform(-1/sqrt(fan_in), 1/sqrt(fan_in)) init, deterministic.
    b1_bound = 1.0 / (feat_len ** 0.5)
    b2_bound = 1.0 / (H ** 0.5)
    w_mlp = jax.random.uniform(k_w1, (H, feat_len), jnp.float32, -b1_bound, b1_bound)
    b_mlp = jax.random.uniform(k_b1, (H,), jnp.float32, -b1_bound, b1_bound)
    w_trans = jax.random.uniform(k_wt, (3, H), jnp.float32, -b2_bound, b2_bound)
    b_trans = jax.random.uniform(k_bt, (3,), jnp.float32, -b2_bound, b2_bound)
    w_quat = jax.random.uniform(k_wq, (4, H), jnp.float32, -b2_bound, b2_bound)
    b_quat = jnp.zeros((4,), jnp.float32)  # self.quat.bias.data.zero_()

    feat = jax.random.normal(k_x, (B, P, feat_len), jnp.float32)

    out = mlp5_forward(feat, w_mlp, b_mlp, w_trans, b_trans, w_quat, b_quat)
    out = jax.block_until_ready(out)

    out_ref = _mlp5_reference(feat, w_mlp, b_mlp, w_trans, b_trans, w_quat, b_quat)
    assert out.shape == (B, P, 7)
    assert jnp.allclose(out, out_ref, atol=1e-5, rtol=1e-5), \
        float(jnp.max(jnp.abs(out - out_ref)))
    # Quaternion part should be unit-norm.
    assert jnp.allclose(jnp.linalg.norm(out[..., 3:], axis=-1), 1.0, atol=1e-5)

    print("KERNEL_OK")
</pallas_src>

<mosaic_0001>
module attributes {stable_mosaic.version = 11 : i64} {
  func.func @_mlp5_kernel(%arg0: i32, %arg1: memref<32x32xf32, #tpu.memory_space<vmem>>, %arg2: memref<32x512xf32, #tpu.memory_space<vmem>>, %arg3: memref<1x512xf32, #tpu.memory_space<vmem>>, %arg4: memref<512x7xf32, #tpu.memory_space<vmem>>, %arg5: memref<1x7xf32, #tpu.memory_space<vmem>>, %arg6: memref<32x7xf32, #tpu.memory_space<vmem>>) attributes {dimension_semantics = [#tpu.dimension_semantics<parallel>], iteration_bounds = array<i64: 1>, scalar_prefetch = 0 : i64, scratch_operands = 0 : i64, tpu.core_type = #tpu.core_type<tc>, window_params = [{transform_indices = @transform_0, window_bounds = array<i64: 32, 32>}, {pipeline_mode = #tpu.pipeline_mode<synchronous>, transform_indices = @transform_1, window_bounds = array<i64: 32, 512>}, {pipeline_mode = #tpu.pipeline_mode<synchronous>, transform_indices = @transform_2, window_bounds = array<i64: 1, 512>}, {pipeline_mode = #tpu.pipeline_mode<synchronous>, transform_indices = @transform_3, window_bounds = array<i64: 512, 7>}, {pipeline_mode = #tpu.pipeline_mode<synchronous>, transform_indices = @transform_4, window_bounds = array<i64: 1, 7>}, {transform_indices = @transform_5, window_bounds = array<i64: 32, 7>}]} {
    %c0 = arith.constant 0 : index
    %c0_0 = arith.constant 0 : index
    %0 = vector.load %arg1[%c0, %c0_0] : memref<32x32xf32, #tpu.memory_space<vmem>>, vector<32x32xf32>
    %c0_1 = arith.constant 0 : index
    %c0_2 = arith.constant 0 : index
    %1 = vector.load %arg2[%c0_1, %c0_2] : memref<32x512xf32, #tpu.memory_space<vmem>>, vector<32x512xf32>
    %cst = arith.constant dense<0.000000e+00> : vector<32x512xf32>
    %2 = tpu.matmul %0, %1, %cst {dimension_numbers = #tpu.dot_dimension_numbers<[1], [0], [0], [1], [0, 0, 1, 1], [], []>} : vector<32x32xf32>, vector<32x512xf32>, vector<32x512xf32> -> vector<32x512xf32>
    %c0_3 = arith.constant 0 : index
    %c0_4 = arith.constant 0 : index
    %3 = vector.load %arg3[%c0_3, %c0_4] : memref<1x512xf32, #tpu.memory_space<vmem>>, vector<1x512xf32>
    %4 = vector.broadcast %3 : vector<1x512xf32> to vector<32x512xf32>
    %5 = arith.addf %2, %4 : vector<32x512xf32>
    %cst_5 = arith.constant 0.000000e+00 : f32
    %6 = vector.broadcast %cst_5 : f32 to vector<32x512xf32>
    %7 = arith.maximumf %5, %6 : vector<32x512xf32>
    %c0_6 = arith.constant 0 : index
    %c0_7 = arith.constant 0 : index
    %8 = vector.load %arg4[%c0_6, %c0_7] : memref<512x7xf32, #tpu.memory_space<vmem>>, vector<512x7xf32>
    %cst_8 = arith.constant dense<0.000000e+00> : vector<32x7xf32>
    %9 = tpu.matmul %7, %8, %cst_8 {dimension_numbers = #tpu.dot_dimension_numbers<[1], [0], [0], [1], [0, 0, 1, 1], [], []>} : vector<32x512xf32>, vector<512x7xf32>, vector<32x7xf32> -> vector<32x7xf32>
    %c0_9 = arith.constant 0 : index
    %c0_10 = arith.constant 0 : index
    %10 = vector.load %arg5[%c0_9, %c0_10] : memref<1x7xf32, #tpu.memory_space<vmem>>, vector<1x7xf32>
    %11 = vector.broadcast %10 : vector<1x7xf32> to vector<32x7xf32>
    %12 = arith.addf %9, %11 : vector<32x7xf32>
    %13 = tpu.iota {dimensions = array<i32: 1>} : vector<32x7xi32>
    %c3_i32 = arith.constant 3 : i32
    %14 = vector.broadcast %c3_i32 : i32 to vector<32x7xi32>
    %15 = arith.cmpi slt, %13, %14 : vector<32x7xi32>
    %cst_11 = arith.constant 0.000000e+00 : f32
    %16 = vector.broadcast %cst_11 : f32 to vector<32x7xf32>
    %17 = arith.select %15, %16, %12 : vector<32x7xi1>, vector<32x7xf32>
    %18 = arith.mulf %17, %17 : vector<32x7xf32>
    %cst_12 = arith.constant dense<0.000000e+00> : vector<32xf32>
    %19 = vector.multi_reduction <add>, %18, %cst_12 [1] : vector<32x7xf32> to vector<32xf32>
    %20 = vector.shape_cast %19 : vector<32xf32> to vector<32x1xf32>
    %cst_13 = arith.constant 9.99999996E-13 : f32
    %21 = vector.broadcast %cst_13 : f32 to vector<32x1xf32>
    %22 = arith.addf %21, %20 : vector<32x1xf32>
    %23 = math.sqrt %22 : vector<32x1xf32>
    %cst_14 = arith.constant 1.000000e+00 : f32
    %24 = vector.broadcast %cst_14 : f32 to vector<32x1xf32>
    %25 = arith.divf %24, %23 : vector<32x1xf32>
    %26 = math.tanh %12 : vector<32x7xf32>
    %27 = vector.broadcast %25 : vector<32x1xf32> to vector<32x7xf32>
    %28 = arith.mulf %12, %27 : vector<32x7xf32>
    %29 = arith.select %15, %26, %28 : vector<32x7xi1>, vector<32x7xf32>
    %c0_15 = arith.constant 0 : index
    %c0_16 = arith.constant 0 : index
    %30 = vector.load %arg6[%c0_15, %c0_16] : memref<32x7xf32, #tpu.memory_space<vmem>>, vector<32x7xf32>
    tpu.vector_store %arg6[%c0_15, %c0_16], %29 {strides = array<i32>} : memref<32x7xf32, #tpu.memory_space<vmem>>, vector<32x7xf32>,
    return
  }
  func.func @transform_0(%arg0: i32) -> (i32, i32) {
    %c0_i32 = arith.constant 0 : i32
    %c0_i32_0 = arith.constant 0 : i32
    return %arg0, %c0_i32 : i32, i32
  }
  func.func @transform_1(%arg0: i32) -> (i32, i32) {
    %c0_i32 = arith.constant 0 : i32
    %c0_i32_0 = arith.constant 0 : i32
    %c0_i32_1 = arith.constant 0 : i32
    return %c0_i32, %c0_i32_0 : i32, i32
  }
  func.func @transform_2(%arg0: i32) -> (i32, i32) {
    %c0_i32 = arith.constant 0 : i32
    %c0_i32_0 = arith.constant 0 : i32
    %c0_i32_1 = arith.constant 0 : i32
    return %c0_i32, %c0_i32_0 : i32, i32
  }
  func.func @transform_3(%arg0: i32) -> (i32, i32) {
    %c0_i32 = arith.constant 0 : i32
    %c0_i32_0 = arith.constant 0 : i32
    %c0_i32_1 = arith.constant 0 : i32
    return %c0_i32, %c0_i32_0 : i32, i32
  }
  func.func @transform_4(%arg0: i32) -> (i32, i32) {
    %c0_i32 = arith.constant 0 : i32
    %c0_i32_0 = arith.constant 0 : i32
    %c0_i32_1 = arith.constant 0 : i32
    return %c0_i32, %c0_i32_0 : i32, i32
  }
  func.func @transform_5(%arg0: i32) -> (i32, i32) {
    %c0_i32 = arith.constant 0 : i32
    %c0_i32_0 = arith.constant 0 : i32
    return %arg0, %c0_i32 : i32, i32
  }
}

</mosaic_0001>

<bundles_post_ra>
// kernel: tpu_custom_call.1
= control target key start
LH: loop header
LB: loop body
LE: loop exit
PB: predicated region body
PF: predicated region fallthrough
CT: control target
= control target key end

     0   :  { %v796_v3 = vmov 0.0   ;;  %vm62_vm0 = vcmask 261120   ;;  %vm521_vm2 = vcmask 56320   ;;  %s1162_s1 = inlined_call_operand.vmem [shape: f32[32,512], index: 1, kind: input, shape index: {}]   ;;  %s1163_s0 = inlined_call_operand.vmem [shape: f32[32,32], index: 0, kind: input, shape index: {}]   ;;  %s1164_s3 = inlined_call_operand.vmem [shape: f32[512,7], index: 3, kind: input, shape index: {}]   ;;  %s1165_s2 = inlined_call_operand.vmem [shape: f32[1,512], index: 2, kind: input, shape index: {}]   ;;  %s1166_s4 = inlined_call_operand.vmem [shape: f32[1,7], index: 4, kind: input, shape index: {}]   ;;  %s1167_s5 = inlined_call_operand.vmem [shape: f32[32,7], index: 5, kind: output, shape index: {}]  }
   0x1   :  { %v25_v0 = vld [vmem:[%s1162_s1 + $0x8] sm:$0xff]  ;;  %v27_v2 = vld [vmem:[%s1162_s1 + $0x18] sm:$0xff]  ;;  %139 = vmatprep.mubr.f32.mxu0 %v796_v3  ;;  %228 = vmatprep.mubr.f32.mxu1 %v796_v3  ;;  %v24_v6 = vld [vmem:[%s1162_s1] sm:$0xff] }
   0x2   :  { %v29_v1 = vld [vmem:[%s1162_s1 + $0x28] sm:$0xff]  ;;  %v31_v5 = vld [vmem:[%s1162_s1 + $0x38] sm:$0xff]  ;;  %v28_v7 = vld [vmem:[%s1162_s1 + $0x20] sm:$0xff] }
   0x3   :  { %v691_v4 = vpack.c.bf16 %v29_v1, %v25_v0  ;;  %v699_v8 = vpack.c.bf16 %v31_v5, %v27_v2  ;;  %v693_v9 = vpack.c.bf16 %v28_v7, %v24_v6  ;;  %v26_v10 = vld [vmem:[%s1162_s1 + $0x10] sm:$0xff]  ;;  %v33_v12 = vld [vmem:[%s1162_s1 + $0x48] sm:$0xff]  ;;  %v35_v15 = vld [vmem:[%s1162_s1 + $0x58] sm:$0xff] }
   0x4   :  { %v30_v11 = vld [vmem:[%s1162_s1 + $0x30] sm:$0xff]  ;;  %v37_v14 = vld [vmem:[%s1162_s1 + $0x68] sm:$0xff]  ;;  %v39_v16 = vld [vmem:[%s1162_s1 + $0x78] sm:$0xff] }
   0x5   :  { %692 = vmatprep.subr.bf16.mxu0 %v691_v4  ;;  %v701_v13 = vpack.c.bf16 %v30_v11, %v26_v10  ;;  %700 = vmatprep.subr.bf16.mxu1 %v699_v8  ;;  %v695_v17 = vpack.c.bf16 %v37_v14, %v33_v12  ;;  %v703_v18 = vpack.c.bf16 %v39_v16, %v35_v15  ;;  %v32_v19 = vld [vmem:[%s1162_s1 + $0x40] sm:$0xff]  ;;  %v34_v21 = vld [vmem:[%s1162_s1 + $0x50] sm:$0xff]  ;;  %v286_v27 = vld [vmem:[%s1164_s3 + $0x88] sm:$0xff] }
   0x6   :  { %694 = vmatpush1.bf16.msra.mxu0 %v693_v9  ;;  %v36_v20 = vld [vmem:[%s1162_s1 + $0x60] sm:$0xff]  ;;  %v38_v23 = vld [vmem:[%s1162_s1 + $0x70] sm:$0xff]  ;;  %v318_v29 = vld [vmem:[%s1164_s3 + $0x188] sm:$0xff] }
   0x7   :  { %702 = vmatpush1.bf16.msra.mxu1 %v701_v13  ;;  %v697_v22 = vpack.c.bf16 %v36_v20, %v32_v19  ;;  %696 = vmatprep.subr.bf16.mxu0 %v695_v17  ;;  %v705_v24 = vpack.c.bf16 %v38_v23, %v34_v21  ;;  %v20_v25 = vld [vmem:[%s1163_s0] sm:$0xff]  ;;  %v270_v33 = vld [vmem:[%s1164_s3 + $0x8] sm:$0xff]  ;;  %v287_v37 = vld [vmem:[%s1164_s3 + $0x90] sm:$0xff] }
   0x8   :  { %704 = vmatprep.subr.bf16.mxu1 %v703_v18  ;;  %v285_v26 = vld [vmem:[%s1164_s3 + $0x80] sm:$0xff]  ;;  %v302_v36 = vld [vmem:[%s1164_s3 + $0x108] sm:$0xff]  ;;  %v288_v38 = vld [vmem:[%s1164_s3 + $0x98] sm:$0xff] }
   0x9   :  { %v317_v28 = vld [vmem:[%s1164_s3 + $0x180] sm:$0xff]  ;;  %v707_v30 = vpack.c.bf16 %v286_v27, %v285_v26  ;;  %v21_v39 = vld [vmem:[%s1163_s0 + $0x8] sm:$0xff]  ;;  %v711_v41 = vpack.c.bf16 %v288_v38, %v287_v37  ;;  %v319_v42 = vld [vmem:[%s1164_s3 + $0x190] sm:$0xff] }
   0xa   :  { %698 = vmatpush1.bf16.msra.mxu0 %v697_v22  ;;  %v739_v31 = vpack.c.bf16 %v318_v29, %v317_v28  ;;  %v269_v32 = vld [vmem:[%s1164_s3] sm:$0xff]  ;;  %v320_v43 = vld [vmem:[%s1164_s3 + $0x198] sm:$0xff]  ;;  %v271_v44 = vld [vmem:[%s1164_s3 + $0x10] sm:$0xff] }
   0xb   :  { %v301_v34 = vld [vmem:[%s1164_s3 + $0x100] sm:$0xff]  ;;  %706 = vmatpush1.bf16.msra.mxu1 %v705_v24  ;;  %v709_v35 = vpack.c.bf16 %v270_v33, %v269_v32  ;;  %708 = vmatprep.subr.bf16.mxu0 %v707_v30  ;;  %v743_v45 = vpack.c.bf16 %v320_v43, %v319_v42  ;;  %v272_v46 = vld [vmem:[%s1164_s3 + $0x18] sm:$0xff]  ;;  %v303_v47 = vld [vmem:[%s1164_s3 + $0x110] sm:$0xff] }
   0xc   :  { %740 = vmatprep.subr.bf16.mxu1 %v739_v31  ;;  %v741_v40 = vpack.c.bf16 %v302_v36, %v301_v34  ;;  %v304_v48 = vld [vmem:[%s1164_s3 + $0x118] sm:$0xff]  ;;  %v289_v49 = vld [vmem:[%s1164_s3 + $0xa0] sm:$0xff]  ;;  %v290_v50 = vld [vmem:[%s1164_s3 + $0xa8] sm:$0xff]  ;;  %v713_v52 = vpack.c.bf16 %v272_v46, %v271_v44 }
   0xd   :  { %594 = vmatmul.mubr.msk.f32.vlgmr.msra.gmra.mrb[0].mxu0 %vm62_vm0, %v20_v25  ;;  %v321_v51 = vld [vmem:[%s1164_s3 + $0x1a0] sm:$0xff]  ;;  %v322_v53 = vld [vmem:[%s1164_s3 + $0x1a8] sm:$0xff]  ;;  %v745_v54 = vpack.c.bf16 %v304_v48, %v303_v47  ;;  %v715_v55 = vpack.c.bf16 %v290_v50, %v289_v49  ;;  %v291_v61 = vld [vmem:[%s1164_s3 + $0xb0] sm:$0xff] }
   0xe   :  { %598 = vmatmul.mubr.msk.f32.vlgmr.msra.gmra.mrb[0].mxu1 %vm62_vm0, %v20_v25  ;;  %145 = vmatprep.mubr.f32.mxu0 %v796_v3  ;;  %v273_v56 = vld [vmem:[%s1164_s3 + $0x20] sm:$0xff]  ;;  %v274_v57 = vld [vmem:[%s1164_s3 + $0x28] sm:$0xff]  ;;  %v747_v59 = vpack.c.bf16 %v322_v53, %v321_v51  ;;  %v292_v62 = vld [vmem:[%s1164_s3 + $0xb8] sm:$0xff] }
   0xf   :  { %234 = vmatprep.mubr.f32.mxu1 %v796_v3  ;;  %710 = vmatpush3.bf16.msra.mxu0 %v709_v35  ;;  %v305_v58 = vld [vmem:[%s1164_s3 + $0x120] sm:$0xff]  ;;  %v306_v60 = vld [vmem:[%s1164_s3 + $0x128] sm:$0xff]  ;;  %v22_v63 = vld [vmem:[%s1163_s0 + $0x10] sm:$0xff]  ;;  %v717_v2 = vpack.c.bf16 %v274_v57, %v273_v56  ;;  %v719_v5 = vpack.c.bf16 %v292_v62, %v291_v61  ;;  %v42_v61 = vlaneseq }
  0x10   :  { %742 = vmatpush3.bf16.msra.mxu1 %v741_v40  ;;  %712 = vmatprep.subr.bf16.mxu0 %v711_v41  ;;  %v323_v0 = vld [vmem:[%s1164_s3 + $0x1b0] sm:$0xff]  ;;  %v324_v1 = vld [vmem:[%s1164_s3 + $0x1b8] sm:$0xff]  ;;  %v749_v4 = vpack.c.bf16 %v306_v60, %v305_v58  ;;  %v293_v11 = vld [vmem:[%s1164_s3 + $0xc0] sm:$0xff] }
  0x11   :  { %595 = vmatmul.mubr.msk.f32.gmra.mrb[2].mxu0 %vm62_vm0, %v21_v39  ;;  %744 = vmatprep.subr.bf16.mxu1 %v743_v45  ;;  %v275_v6 = vld [vmem:[%s1164_s3 + $0x30] sm:$0xff]  ;;  %v276_v7 = vld [vmem:[%s1164_s3 + $0x38] sm:$0xff]  ;;  %v751_v9 = vpack.c.bf16 %v324_v1, %v323_v0  ;;  %v294_v12 = vld [vmem:[%s1164_s3 + $0xc8] sm:$0xff]  ;;  %v43_v62 = vshrl.u32 %v42_v61, 7 }
  0x12   :  { %599 = vmatmul.mubr.msk.f32.gmra.mrb[2].mxu1 %vm62_vm0, %v21_v39  ;;  %151 = vmatprep.mubr.f32.mxu0 %v796_v3  ;;  %v307_v8 = vld [vmem:[%s1164_s3 + $0x130] sm:$0xff]  ;;  %v308_v10 = vld [vmem:[%s1164_s3 + $0x138] sm:$0xff]  ;;  %v325_v14 = vld [vmem:[%s1164_s3 + $0x1c0] sm:$0xff]  ;;  %v721_v16 = vpack.c.bf16 %v276_v7, %v275_v6  ;;  %v723_v18 = vpack.c.bf16 %v294_v12, %v293_v11 }
  0x13   :  { %240 = vmatprep.mubr.f32.mxu1 %v796_v3  ;;  %714 = vmatpush3.bf16.msra.mxu0 %v713_v52  ;;  %v23_v13 = vld [vmem:[%s1163_s0 + $0x18] sm:$0xff]  ;;  %v326_v15 = vld [vmem:[%s1164_s3 + $0x1c8] sm:$0xff]  ;;  %v753_v17 = vpack.c.bf16 %v308_v10, %v307_v8  ;;  %v277_v19 = vld [vmem:[%s1164_s3 + $0x40] sm:$0xff]  ;;  %v52_v1 = vsub.s32 2, %v43_v62 }
  0x14   :  { %746 = vmatpush3.bf16.msra.mxu1 %v745_v54  ;;  %716 = vmatprep.subr.bf16.mxu0 %v715_v55  ;;  %v278_v20 = vld [vmem:[%s1164_s3 + $0x48] sm:$0xff]  ;;  %v309_v21 = vld [vmem:[%s1164_s3 + $0x140] sm:$0xff]  ;;  %v295_v23 = vld [vmem:[%s1164_s3 + $0xd0] sm:$0xff] }
  0x15   :  { %596 = vmatmul.mubr.msk.f32.gmra.mrb[4].mxu0 %vm62_vm0, %v22_v63  ;;  %748 = vmatprep.subr.bf16.mxu1 %v747_v59  ;;  %v310_v22 = vld [vmem:[%s1164_s3 + $0x148] sm:$0xff]  ;;  %v296_v24 = vld [vmem:[%s1164_s3 + $0xd8] sm:$0xff]  ;;  %v327_v25 = vld [vmem:[%s1164_s3 + $0x1d0] sm:$0xff]  ;;  %v725_v27 = vpack.c.bf16 %v278_v20, %v277_v19 }
  0x16   :  { %600 = vmatmul.mubr.msk.f32.gmra.mrb[4].mxu1 %vm62_vm0, %v22_v63  ;;  %157 = vmatprep.mubr.f32.mxu0 %v796_v3  ;;  %v328_v26 = vld [vmem:[%s1164_s3 + $0x1d8] sm:$0xff]  ;;  %v757_v28 = vpack.c.bf16 %v310_v22, %v309_v21  ;;  %v727_v29 = vpack.c.bf16 %v296_v24, %v295_v23  ;;  %v279_v30 = vld [vmem:[%s1164_s3 + $0x50] sm:$0xff]  ;;  %v297_v35 = vld [vmem:[%s1164_s3 + $0xe0] sm:$0xff]  ;;  %v44_v63 = vsub.s32 0, %v43_v62 }
  0x17   :  { %246 = vmatprep.mubr.f32.mxu1 %v796_v3  ;;  %718 = vmatpush3.bf16.msra.mxu0 %v717_v2  ;;  %v755_v3 = vpack.c.bf16 %v326_v15, %v325_v14  ;;  %v280_v31 = vld [vmem:[%s1164_s3 + $0x58] sm:$0xff]  ;;  %v311_v32 = vld [vmem:[%s1164_s3 + $0x150] sm:$0xff]  ;;  %v759_v33 = vpack.c.bf16 %v328_v26, %v327_v25  ;;  %v298_v36 = vld [vmem:[%s1164_s3 + $0xe8] sm:$0xff]  ;;  %v48_v2 = vsub.s32 1, %v43_v62 }
  0x18   :  { %750 = vmatpush3.bf16.msra.mxu1 %v749_v4  ;;  %720 = vmatprep.subr.bf16.mxu0 %v719_v5  ;;  %v312_v34 = vld [vmem:[%s1164_s3 + $0x158] sm:$0xff]  ;;  %v329_v37 = vld [vmem:[%s1164_s3 + $0x1e0] sm:$0xff]  ;;  %v330_v38 = vld [vmem:[%s1164_s3 + $0x1e8] sm:$0xff]  ;;  %v729_v39 = vpack.c.bf16 %v280_v31, %v279_v30  ;;  %v731_v41 = vpack.c.bf16 %v298_v36, %v297_v35  ;;  %v56_v4 = vsub.s32 3, %v43_v62 }
  0x19   :  { %597 = vmatmul.mubr.msk.f32.gmra.mrb[6].mxu0 %vm62_vm0, %v23_v13  ;;  %752 = vmatprep.subr.bf16.mxu1 %v751_v9  ;;  %v761_v40 = vpack.c.bf16 %v312_v34, %v311_v32  ;;  %v763_v42 = vpack.c.bf16 %v330_v38, %v329_v37  ;;  %v281_v43 = vld [vmem:[%s1164_s3 + $0x60] sm:$0xff]  ;;  %v282_v44 = vld [vmem:[%s1164_s3 + $0x68] sm:$0xff]  ;;  %v299_v49 = vld [vmem:[%s1164_s3 + $0xf0] sm:$0xff] }
  0x1a   :  { %601 = vmatmul.mubr.msk.f32.gmra.mrb[6].mxu1 %vm62_vm0, %v23_v13  ;;  %v313_v45 = vld [vmem:[%s1164_s3 + $0x160] sm:$0xff]  ;;  %v733_v46 = vpack.c.bf16 %v282_v44, %v281_v43  ;;  %v314_v47 = vld [vmem:[%s1164_s3 + $0x168] sm:$0xff]  ;;  %v300_v50 = vld [vmem:[%s1164_s3 + $0xf8] sm:$0xff] }
  0x1b   :  { %722 = vmatpush3.bf16.msra.mxu0 %v721_v16  ;;  %v765_v48 = vpack.c.bf16 %v314_v47, %v313_v45  ;;  %v331_v51 = vld [vmem:[%s1164_s3 + $0x1f0] sm:$0xff]  ;;  %v735_v52 = vpack.c.bf16 %v300_v50, %v299_v49  ;;  %v332_v53 = vld [vmem:[%s1164_s3 + $0x1f8] sm:$0xff]  ;;  %v40_v0 = vld [vmem:[%s1165_s2] sm:$0xf] }
  0x1c   :  { %754 = vmatpush3.bf16.msra.mxu1 %v753_v17  ;;  %724 = vmatprep.subr.bf16.mxu0 %v723_v18  ;;  %v283_v54 = vld [vmem:[%s1164_s3 + $0x70] sm:$0xff]  ;;  %v284_v55 = vld [vmem:[%s1164_s3 + $0x78] sm:$0xff]  ;;  %v767_v56 = vpack.c.bf16 %v332_v53, %v331_v51  ;;  %v45_v5 = vrot.slane %v40_v0, %v44_v63  ;;  %v53_v6 = vrot.slane %v40_v0, %v52_v1 }
  0x1d   :  { %756 = vmatprep.subr.bf16.mxu1 %v755_v3  ;;  %v737_v57 = vpack.c.bf16 %v284_v55, %v283_v54  ;;  %v315_v58 = vld [vmem:[%s1164_s3 + $0x170] sm:$0xff]  ;;  %v316_v59 = vld [vmem:[%s1164_s3 + $0x178] sm:$0xff]  ;;  %v49_v7 = vrot.slane %v40_v0, %v48_v2  ;;  %v57_v8 = vrot.slane %v40_v0, %v56_v4 }
  0x1e   :  { %v769_v60 = vpack.c.bf16 %v316_v59, %v315_v58  ;;  %v602_v58 = vld [vmem:[%s1166_s4] ss:$0 sm:$0xff] }
  0x1f   :  { %726 = vmatpush3.bf16.msra.mxu0 %v725_v27 }
  0x20   :  { %758 = vmatpush3.bf16.msra.mxu1 %v757_v28  ;;  %728 = vmatprep.subr.bf16.mxu0 %v727_v29 }
  0x21   :  { %760 = vmatprep.subr.bf16.mxu1 %v759_v33 }
  0x23   :  { %730 = vmatpush3.bf16.msra.mxu0 %v729_v39 }
  0x24   :  { %762 = vmatpush3.bf16.msra.mxu1 %v761_v40  ;;  %732 = vmatprep.subr.bf16.mxu0 %v731_v41 }
  0x25   :  { %764 = vmatprep.subr.bf16.mxu1 %v763_v42 }
  0x27   :  { %734 = vmatpush3.bf16.msra.mxu0 %v733_v46 }
  0x28   :  { %766 = vmatpush3.bf16.msra.mxu1 %v765_v48  ;;  %736 = vmatprep.subr.bf16.mxu0 %v735_v52 }
  0x29   :  { %768 = vmatprep.subr.bf16.mxu1 %v767_v56 }
  0x2b   :  { %738 = vmatpush3.bf16.msra.mxu0 %v737_v57 }
  0x2c   :  { %770 = vmatpush3.bf16.msra.mxu1 %v769_v60  ;;  %v1103_v60 = vand.u32 127, %v42_v61 }
  0x2e   :  { %vm512_vm1 = vcmp.lt.s32.totalorder %v1103_v60, 3 }
  0xe0   :  { %v141_v9 = vpop.f32.mrb[0].mxu0 }
  0xe1   :  { %v142_v10 = vadd.f32 %v141_v9, %v45_v5  ;;  %v230_v11 = vpop.f32.mrb[0].mxu1  ;;  %v143_v12 = vpop.f32.mrb[1].mxu0 }
  0xe2   :  { %v231_v13 = vadd.f32 %v230_v11, %v53_v6  ;;  %v144_v14 = vadd.f32 %v143_v12, %v49_v7  ;;  %v232_v15 = vpop.f32.mrb[1].mxu1 }
  0xe3   :  { %v233_v16 = vadd.f32 %v232_v15, %v57_v8  ;;  %v253_v20 = vmax.f32 %v142_v10, 0.0 }
  0xe4   :  { %v255_v17 = vmax.f32 %v231_v13, 0.0  ;;  %v254_v18 = vmax.f32 %v144_v14, 0.0  ;;  %v147_v19 = vpop.f32.mrb[2].mxu0 }
  0xe5   :  { %v256_v21 = vmax.f32 %v233_v16, 0.0  ;;  %v148_v3 = vadd.f32 %v147_v19, %v45_v5  ;;  %v236_v22 = vpop.f32.mrb[2].mxu1  ;;  %v149_v23 = vpop.f32.mrb[3].mxu0 }
  0xe6   :  { %v237_v24 = vadd.f32 %v236_v22, %v53_v6  ;;  %v150_v25 = vadd.f32 %v149_v23, %v49_v7  ;;  %v238_v26 = vpop.f32.mrb[3].mxu1  ;;  %404 = vmatprep.mubr.f32.mxu0 %v254_v18 }
  0xe7   :  { %v239_v27 = vadd.f32 %v238_v26, %v57_v8  ;;  %489 = vmatprep.mubr.f32.mxu1 %v256_v21  ;;  %405 = vmatmul.mubr.f32.vlgmr.msra.gmra.mrb[8].mxu0 %v253_v20  ;;  %v257_v31 = vmax.f32 %v148_v3, 0.0 }
  0xe8   :  { %v259_v28 = vmax.f32 %v237_v24, 0.0  ;;  %v258_v29 = vmax.f32 %v150_v25, 0.0  ;;  %490 = vmatmul.mubr.f32.vlgmr.msra.gmra.mrb[8].mxu1 %v255_v17  ;;  %v153_v30 = vpop.f32.mrb[4].mxu0 }
  0xe9   :  { %v260_v32 = vmax.f32 %v239_v27, 0.0  ;;  %v154_v33 = vadd.f32 %v153_v30, %v45_v5  ;;  %v242_v34 = vpop.f32.mrb[4].mxu1  ;;  %v155_v35 = vpop.f32.mrb[5].mxu0 }
  0xea   :  { %v243_v36 = vadd.f32 %v242_v34, %v53_v6  ;;  %v156_v37 = vadd.f32 %v155_v35, %v49_v7  ;;  %v244_v38 = vpop.f32.mrb[5].mxu1  ;;  %409 = vmatprep.mubr.f32.mxu0 %v258_v29 }
  0xeb   :  { %v245_v39 = vadd.f32 %v244_v38, %v57_v8  ;;  %494 = vmatprep.mubr.f32.mxu1 %v260_v32  ;;  %410 = vmatmul.mubr.f32.gmra.mrb[10].mxu0 %v257_v31  ;;  %v261_v43 = vmax.f32 %v154_v33, 0.0 }
  0xec   :  { %v263_v40 = vmax.f32 %v243_v36, 0.0  ;;  %v262_v41 = vmax.f32 %v156_v37, 0.0  ;;  %495 = vmatmul.mubr.f32.gmra.mrb[10].mxu1 %v259_v28  ;;  %v159_v42 = vpop.f32.mrb[6].mxu0 }
  0xed   :  { %v264_v44 = vmax.f32 %v245_v39, 0.0  ;;  %v160_v45 = vadd.f32 %v159_v42, %v45_v5  ;;  %v248_v46 = vpop.f32.mrb[6].mxu1  ;;  %v161_v47 = vpop.f32.mrb[7].mxu0 }
  0xee   :  { %v249_v48 = vadd.f32 %v248_v46, %v53_v6  ;;  %v162_v49 = vadd.f32 %v161_v47, %v49_v7  ;;  %v250_v50 = vpop.f32.mrb[7].mxu1  ;;  %414 = vmatprep.mubr.f32.mxu0 %v262_v41 }
  0xef   :  { %v251_v51 = vadd.f32 %v250_v50, %v57_v8  ;;  %499 = vmatprep.mubr.f32.mxu1 %v264_v44  ;;  %415 = vmatmul.mubr.f32.gmra.mrb[12].mxu0 %v261_v43  ;;  %v265_v54 = vmax.f32 %v160_v45, 0.0 }
  0xf0   :  { %v267_v52 = vmax.f32 %v249_v48, 0.0  ;;  %v266_v53 = vmax.f32 %v162_v49, 0.0  ;;  %500 = vmatmul.mubr.f32.gmra.mrb[12].mxu1 %v263_v40 }
  0xf1   :  { %v268_v55 = vmax.f32 %v251_v51, 0.0 }
  0xf2   :  { %419 = vmatprep.mubr.f32.mxu0 %v266_v53 }
  0xf3   :  { %504 = vmatprep.mubr.f32.mxu1 %v268_v55  ;;  %420 = vmatmul.mubr.f32.gmra.mrb[14].mxu0 %v265_v54 }
  0xf4   :  { %505 = vmatmul.mubr.f32.gmra.mrb[14].mxu1 %v267_v52 }
 0x1ba   :  { %v635_v56 = vpop.f32.mrb[8].mxu0 }
 0x1bb   :  { %v679_v57 = vpop.f32.mrb[8].mxu1  ;;  %v636_v59 = vpop.f32.mrb[9].mxu0 }
 0x1bc   :  { %v637_v62 = vadd.f32 %v636_v59, %v635_v56  ;;  %v680_v63 = vpop.f32.mrb[9].mxu1 }
 0x1bd   :  { %v681_v0 = vadd.f32 %v680_v63, %v679_v57 }
 0x1be   :  { %v407_v1 = vadd.f32 %v637_v62, %v602_v58  ;;  %v638_v2 = vpop.f32.mrb[10].mxu0 }
 0x1bf   :  { %v682_v4 = vpop.f32.mrb[10].mxu1  ;;  %v639_v5 = vpop.f32.mrb[11].mxu0 }
 0x1c0   :  { %v1106_v6 = vadd.f32 %v681_v0, %v407_v1  ;;  %v640_v7 = vadd.f32 %v639_v5, %v638_v2  ;;  %v683_v8 = vpop.f32.mrb[11].mxu1 }
 0x1c1   :  { %v684_v9 = vadd.f32 %v683_v8, %v682_v4 }
 0x1c2   :  { %v412_v10 = vadd.f32 %v640_v7, %v602_v58  ;;  %v641_v11 = vpop.f32.mrb[12].mxu0  ;;  %v513_v61 = vsel %vm512_vm1, 0.0, %v1106_v6 }
 0x1c3   :  { %v685_v12 = vpop.f32.mrb[12].mxu1  ;;  %v642_v13 = vpop.f32.mrb[13].mxu0  ;;  %v517_v14 = vmul.f32 %v513_v61, %v513_v61 }
 0x1c4   :  { %v1111_v15 = vadd.f32 %v684_v9, %v412_v10  ;;  %v643_v16 = vadd.f32 %v642_v13, %v641_v11  ;;  %v686_v17 = vpop.f32.mrb[13].mxu1 }
 0x1c5   :  { %v687_v18 = vadd.f32 %v686_v17, %v685_v12  ;;  %v522_v19 = vsel %vm521_vm2, %v517_v14, 0.0 }
 0x1c6   :  { %v417_v20 = vadd.f32 %v643_v16, %v602_v58  ;;  %v644_v21 = vpop.f32.mrb[14].mxu0  ;;  %523 = vadd.xlane.f32.xlu0 %v522_v19  ;;  %v514_v3 = vsel %vm512_vm1, 0.0, %v1111_v15 }
 0x1c7   :  { %v688_v22 = vpop.f32.mrb[14].mxu1  ;;  %v645_v23 = vpop.f32.mrb[15].mxu0  ;;  %v518_v24 = vmul.f32 %v514_v3, %v514_v3 }
 0x1c8   :  { %v1117_v25 = vadd.f32 %v687_v18, %v417_v20  ;;  %v646_v26 = vadd.f32 %v645_v23, %v644_v21  ;;  %v689_v27 = vpop.f32.mrb[15].mxu1 }
 0x1c9   :  { %v690_v28 = vadd.f32 %v689_v27, %v688_v22  ;;  %v525_v29 = vsel %vm521_vm2, %v518_v24, 0.0 }
 0x1ca   :  { %v422_v30 = vadd.f32 %v646_v26, %v602_v58  ;;  %526 = vadd.xlane.f32.xlu0 %v525_v29  ;;  %v515_v31 = vsel %vm512_vm1, 0.0, %v1117_v25 }
 0x1cb   :  { %v519_v32 = vmul.f32 %v515_v31, %v515_v31 }
 0x1cc   :  { %v1123_v33 = vadd.f32 %v690_v28, %v422_v30 }
 0x1cd   :  { %v528_v34 = vsel %vm521_vm2, %v519_v32, 0.0 }
 0x1ce   :  { %529 = vadd.xlane.f32.xlu1 %v528_v34  ;;  %v516_v35 = vsel %vm512_vm1, 0.0, %v1123_v33 }
 0x1cf   :  { %v520_v36 = vmul.f32 %v516_v35, %v516_v35 }
 0x1d1   :  { %v531_v37 = vsel %vm521_vm2, %v520_v36, 0.0 }
 0x1d2   :  { %532 = vadd.xlane.f32.xlu1 %v531_v37 }
 0x253   :  { %v524_v38 = vpop.xlane.xlu0 %523 }
 0x254   :  { %v534_v39 = vadd.f32 1e-12, %v524_v38 }
 0x256   :  { %772 = vrsqrt.f32 %v534_v39  ;;  %vm540_vm3 = vcmp.eq.f32.partialorder %v534_v39, inf  ;;  %v543_v48 = vand.u32 2147483648, %v534_v39  ;;  %vm542_vm4 = vcmp.eq.f32.partialorder %v534_v39, 0.0 }
 0x257   :  { %v527_v40 = vpop.xlane.xlu0 %526 }
 0x258   :  { %v535_v41 = vadd.f32 1e-12, %v527_v40 }
 0x25a   :  { %774 = vrsqrt.f32 %v535_v41  ;;  %vm547_vm5 = vcmp.eq.f32.partialorder %v535_v41, inf  ;;  %v550_v53 = vand.u32 2147483648, %v535_v41  ;;  %vm549_vm6 = vcmp.eq.f32.partialorder %v535_v41, 0.0 }
 0x25b   :  { %v530_v42 = vpop.xlane.xlu1 %529 }
 0x25c   :  { %v536_v43 = vadd.f32 1e-12, %v530_v42 }
 0x25e   :  { %776 = vrsqrt.f32 %v536_v43  ;;  %vm554_vm7 = vcmp.eq.f32.partialorder %v536_v43, inf  ;;  %v557_v58 = vand.u32 2147483648, %v536_v43  ;;  %vm556_vm8 = vcmp.eq.f32.partialorder %v536_v43, 0.0 }
 0x25f   :  { %v533_v44 = vpop.xlane.xlu1 %532 }
 0x260   :  { %v773_v45 = vpop.eup %772  ;;  %v537_v46 = vadd.f32 1e-12, %v533_v44 }
 0x261   :  { %v539_v47 = vmul.f32 %v773_v45, %v534_v39 }
 0x262   :  { %778 = vrsqrt.f32 %v537_v46  ;;  %vm561_vm9 = vcmp.eq.f32.partialorder %v537_v46, inf  ;;  %v564_v1 = vand.u32 2147483648, %v537_v46  ;;  %vm563_vm10 = vcmp.eq.f32.partialorder %v537_v46, 0.0 }
 0x263   :  { %v541_v49 = vsel %vm540_vm3, %v534_v39, %v539_v47 }
 0x264   :  { %v775_v50 = vpop.eup %774  ;;  %v544_v51 = vsel %vm542_vm4, %v543_v48, %v541_v49 }
 0x265   :  { %780 = vrcp.f32 %v544_v51  ;;  %v546_v52 = vmul.f32 %v775_v50, %v535_v41 }
 0x266   :  { %782 = vtanh.f32 %v1106_v6 }
 0x267   :  { %v548_v54 = vsel %vm547_vm5, %v535_v41, %v546_v52 }
 0x268   :  { %v777_v55 = vpop.eup %776  ;;  %v551_v56 = vsel %vm549_vm6, %v550_v53, %v548_v54 }
 0x269   :  { %784 = vrcp.f32 %v551_v56  ;;  %v553_v57 = vmul.f32 %v777_v55, %v536_v43 }
 0x26a   :  { %786 = vtanh.f32 %v1111_v15 }
 0x26b   :  { %v555_v59 = vsel %vm554_vm7, %v536_v43, %v553_v57 }
 0x26c   :  { %v779_v62 = vpop.eup %778  ;;  %v558_v63 = vsel %vm556_vm8, %v557_v58, %v555_v59 }
 0x26d   :  { %788 = vrcp.f32 %v558_v63  ;;  %v560_v0 = vmul.f32 %v779_v62, %v537_v46 }
 0x26e   :  { %790 = vtanh.f32 %v1117_v25 }
 0x26f   :  { %v781_v2 = vpop.eup %780  ;;  %v562_v4 = vsel %vm561_vm9, %v537_v46, %v560_v0 }
 0x270   :  { %v578_v5 = vmul.f32 %v781_v2, %v1106_v6  ;;  %v565_v7 = vsel %vm563_vm10, %v564_v1, %v562_v4  ;;  %v783_v8 = vpop.eup %782 }
 0x271   :  { %792 = vrcp.f32 %v565_v7 }
 0x272   :  { %v582_v9 = vsel %vm512_vm1, %v783_v8, %v578_v5  ;;  %794 = vtanh.f32 %v1123_v33 }
 0x273   :  { %v785_v10 = vpop.eup %784  ;;  %586 = vst.msk [vmem:[%s1167_s5] sm:$0xff] %vm521_vm2, %v582_v9 }
 0x274   :  { %v579_v11 = vmul.f32 %v785_v10, %v1111_v15  ;;  %v787_v61 = vpop.eup %786 }
 0x276   :  { %v583_v6 = vsel %vm512_vm1, %v787_v61, %v579_v11 }
 0x277   :  { %v789_v12 = vpop.eup %788  ;;  %587 = vst.msk [vmem:[%s1167_s5 + $0x8] sm:$0xff] %vm521_vm2, %v583_v6 }
 0x278   :  { %v580_v13 = vmul.f32 %v789_v12, %v1117_v25  ;;  %v791_v14 = vpop.eup %790 }
 0x27a   :  { %v584_v16 = vsel %vm512_vm1, %v791_v14, %v580_v13 }
 0x27b   :  { %v793_v17 = vpop.eup %792  ;;  %588 = vst.msk [vmem:[%s1167_s5 + $0x10] sm:$0xff] %vm521_vm2, %v584_v16 }
 0x27c   :  { %v581_v15 = vmul.f32 %v793_v17, %v1123_v33  ;;  %v795_v18 = vpop.eup %794 }
 0x27e   :  { %v585_v19 = vsel %vm512_vm1, %v795_v18, %v581_v15 }
 0x27f   :  { %589 = vst.msk [vmem:[%s1167_s5 + $0x18] sm:$0xff] %vm521_vm2, %v585_v19 }

</bundles_post_ra>
